<compile_context>
chip_gen: v5e
topology: v5e:2x2
jax: 0.10.0
libtpu: 0.0.40
codegen_flags: <defaults>
</compile_context>

<pallas_src>
import functools

import jax
import jax.numpy as jnp
from jax import lax
from jax.experimental import pallas as pl
from jax.experimental.pallas import tpu as pltpu


# <= 64 MiB physical VMEM on v7x (v5e/v6e have 128 MiB); worst-case tiles below
# need ~24 MiB double-buffered, so this leaves headroom for internal scratch.
_VMEM_LIMIT_BYTES = 48 * 1024 * 1024


def _round_up(x, m):
    return ((x + m - 1) // m) * m


def _fast_recip(x):
    # EUP approximate reciprocal (otherwise-idle slot) + one Newton-Raphson
    # refinement -> ~f32-exact without a VALU divide on the critical path.
    r = pl.reciprocal(x, approx=True)
    return r * (2.0 - x * r)


# ---------------------------------------------------------------------------
# LayerNorm kernel (torch: a * (x - mean) / (std_unbiased + eps) + b)
# ---------------------------------------------------------------------------
def _layernorm_kernel(x_ref, a_ref, b_ref, o_ref, *, eps):
    x = x_ref[...].astype(jnp.float32)                 # (block_rows, F)
    f = x.shape[-1]
    mean = jnp.sum(x, axis=-1, keepdims=True) * jnp.float32(1.0 / f)
    cx = x - mean
    # Centered (two-pass over the in-VMEM tile) variance: no catastrophic
    # cancellation, and still only one HBM read per tile (memory-bound op).
    var = jnp.sum(cx * cx, axis=-1, keepdims=True) * jnp.float32(1.0 / max(f - 1, 1))
    inv = _fast_recip(jnp.sqrt(var) + jnp.float32(eps))
    a = a_ref[...].astype(jnp.float32)
    b = b_ref[...].astype(jnp.float32)
    o_ref[...] = (a * cx * inv + b).astype(o_ref.dtype)


def _pick_ln_block_rows(rows, features, itemsize):
    # Sublane packing: 8 rows for f32, 16 for bf16, 32 for int8/fp8.
    sublane = {4: 8, 2: 16, 1: 32}.get(itemsize, 8)
    # A few MiB per input block so (input + output) double-buffered stays well
    # under the VMEM limit while amortizing the ~0.35us/step grid overhead.
    target_block_bytes = 6 * 1024 * 1024
    br = max(sublane, target_block_bytes // max(features * 4, 1))
    br = min(br, 1024, _round_up(rows, sublane))
    # Prefer >= 2 row blocks so v7x's second TensorCore gets work (a single
    # extra ~0.35us grid step on 1-TC v5e/v6e).
    if rows >= 2 * sublane:
        br = min(br, _round_up((rows + 1) // 2, sublane))
    return _round_up(br, sublane)


def layer_norm(x, a_2, b_2, eps=1e-6):
    """LayerNorm over the last axis of x; a_2/b_2 have shape (features,)."""
    orig_shape = x.shape
    features = orig_shape[-1]
    rows = 1
    for d in orig_shape[:-1]:
        rows *= d
    x2 = x.reshape(rows, features)
    a2 = a_2.reshape(1, features)
    b2 = b_2.reshape(1, features)

    block_rows = _pick_ln_block_rows(rows, features, jnp.dtype(x.dtype).itemsize)
    rows_p = _round_up(rows, block_rows)       # cdiv-style grid via zero padding
    if rows_p != rows:
        # NOTE: padding must stay exactly zero so padded rows give cx == 0.
        x2 = jnp.pad(x2, ((0, rows_p - rows), (0, 0)))
    grid = (rows_p // block_rows,)

    out = pl.pallas_call(
        functools.partial(_layernorm_kernel, eps=eps),
        out_shape=jax.ShapeDtypeStruct((rows_p, features), x.dtype),
        grid_spec=pltpu.PrefetchScalarGridSpec(
            num_scalar_prefetch=0,
            grid=grid,
            in_specs=[
                pl.BlockSpec((block_rows, features), lambda i: (i, 0)),
                pl.BlockSpec((1, features), lambda i: (0, 0)),
                pl.BlockSpec((1, features), lambda i: (0, 0)),
            ],
            out_specs=pl.BlockSpec((block_rows, features), lambda i: (i, 0)),
        ),
        compiler_params=pltpu.CompilerParams(
            dimension_semantics=("parallel",),
            vmem_limit_bytes=_VMEM_LIMIT_BYTES,
        ),
    )(x2, a2, b2)
    if rows_p != rows:
        out = out[:rows]
    return out.reshape(orig_shape)


# ---------------------------------------------------------------------------
# Linear kernel: y = x @ w + b  (optional fused ReLU and fused residual add)
# MXU inputs cast to bf16 (native rate on v5e/v6e/v7x), f32 accumulator.
# ---------------------------------------------------------------------------
def _linear_epilogue(acc_ref, b_ref, o_ref, activation, residual):
    y = acc_ref[...] + b_ref[...].astype(jnp.float32)
    if activation == "relu":
        y = jnp.maximum(y, 0.0)
    if residual is not None:
        y = y + residual
    o_ref[...] = y.astype(o_ref.dtype)


def _linear_kernel(x_ref, w_ref, b_ref, o_ref, acc_ref, *, activation):
    @pl.when(pl.program_id(2) == 0)
    def _():
        acc_ref[...] = jnp.zeros_like(acc_ref)

    acc_ref[...] += jnp.dot(x_ref[...].astype(jnp.bfloat16),
                            w_ref[...].astype(jnp.bfloat16),
                            preferred_element_type=jnp.float32)

    @pl.when(pl.program_id(2) == pl.num_programs(2) - 1)
    def _():
        _linear_epilogue(acc_ref, b_ref, o_ref, activation, None)


def _linear_res_kernel(x_ref, w_ref, b_ref, r_ref, o_ref, acc_ref, *, activation):
    @pl.when(pl.program_id(2) == 0)
    def _():
        acc_ref[...] = jnp.zeros_like(acc_ref)

    acc_ref[...] += jnp.dot(x_ref[...].astype(jnp.bfloat16),
                            w_ref[...].astype(jnp.bfloat16),
                            preferred_element_type=jnp.float32)

    @pl.when(pl.program_id(2) == pl.num_programs(2) - 1)
    def _():
        _linear_epilogue(acc_ref, b_ref, o_ref, activation,
                         r_ref[...].astype(jnp.float32))


def _pick_linear_tiles(rows, k_dim, n_dim):
    tn = min(512, _round_up(n_dim, 128))       # lane-dense output tiles
    tk = min(1024, _round_up(k_dim, 128))
    tm = min(512, _round_up(rows, 16))         # 16-row multiples (bf16 packing)
    # v7x has 2 TensorCores: try to keep >= 2 blocks along the parallel M axis
    # when there are enough rows (one extra grid step on 1-TC v5e/v6e).
    if rows >= 32 and rows <= tm:
        tm = min(512, _round_up((rows + 1) // 2, 16))
    return tm, tn, tk


def linear(x, w, b, activation=None, residual=None):
    """x: (..., K), w: (K, N), b: (N,) -> (..., N); optional fused residual."""
    orig_shape = x.shape
    k_dim = orig_shape[-1]
    n_dim = w.shape[1]
    rows = 1
    for d in orig_shape[:-1]:
        rows *= d
    x2 = x.reshape(rows, k_dim)

    tm, tn, tk = _pick_linear_tiles(rows, k_dim, n_dim)
    mp = _round_up(rows, tm)
    np_ = _round_up(n_dim, tn)
    kp = _round_up(k_dim, tk)

    if (mp, kp) != (rows, k_dim):
        x2 = jnp.pad(x2, ((0, mp - rows), (0, kp - k_dim)))
    wp = w if (kp, np_) == (k_dim, n_dim) else jnp.pad(
        w, ((0, kp - k_dim), (0, np_ - n_dim)))
    bp = (b if np_ == n_dim else jnp.pad(b, (0, np_ - n_dim))).reshape(1, np_)

    in_specs = [
        pl.BlockSpec((tm, tk), lambda i, j, k: (i, k)),
        pl.BlockSpec((tk, tn), lambda i, j, k: (k, j)),
        pl.BlockSpec((1, tn), lambda i, j, k: (0, j)),
    ]
    args = [x2, wp, bp]
    if residual is not None:
        r2 = residual.reshape(rows, n_dim)
        if (mp, np_) != (rows, n_dim):
            r2 = jnp.pad(r2, ((0, mp - rows), (0, np_ - n_dim)))
        # index_map independent of k -> residual tile is DMA'd once per (i, j).
        in_specs.append(pl.BlockSpec((tm, tn), lambda i, j, k: (i, j)))
        args.append(r2)
        kernel = functools.partial(_linear_res_kernel, activation=activation)
    else:
        kernel = functools.partial(_linear_kernel, activation=activation)

    grid = (mp // tm, np_ // tn, kp // tk)
    out = pl.pallas_call(
        kernel,
        out_shape=jax.ShapeDtypeStruct((mp, np_), x.dtype),
        grid_spec=pltpu.PrefetchScalarGridSpec(
            num_scalar_prefetch=0,
            grid=grid,
            in_specs=in_specs,
            out_specs=pl.BlockSpec((tm, tn), lambda i, j, k: (i, j)),
            scratch_shapes=[pltpu.VMEM((tm, tn), jnp.float32)],
        ),
        compiler_params=pltpu.CompilerParams(
            dimension_semantics=("parallel", "parallel", "arbitrary"),
            vmem_limit_bytes=_VMEM_LIMIT_BYTES,
        ),
    )(*args)
    out = out[:rows, :n_dim]
    return out.reshape(orig_shape[:-1] + (n_dim,))


# ---------------------------------------------------------------------------
# Fused, head-merged scaled-dot-product attention (mask is always None here).
# Inputs/outputs keep the (seq, h*d_k) lane-dense layout; heads are split with
# static lane slices inside the kernel.  Q/K/V may live in a single fused
# projection output; the *_off arguments select the d_model-wide feature block
# at the BlockSpec/DMA level (no wrapper-side slices/copies).
# ---------------------------------------------------------------------------
def _attention_kernel(q_ref, k_ref, v_ref, o_ref, *, h, scale):
    # Refs are (Sq, d_model) / (Sk, d_model): the batch grid dim is squeezed.
    dm = q_ref.shape[-1]
    dk = dm // h
    # Scale the (small) q tile, not the (Sq, Sk) score matrix.
    q = q_ref[...].astype(jnp.float32) * scale
    k = k_ref[...].astype(jnp.float32)
    v = v_ref[...].astype(jnp.float32)
    outs = []
    for hd in range(h):
        sl = slice(hd * dk, (hd + 1) * dk)
        qh = q[:, sl].astype(jnp.bfloat16)
        kh = k[:, sl].astype(jnp.bfloat16)
        vh = v[:, sl].astype(jnp.bfloat16)
        s = lax.dot_general(qh, kh, (((1,), (1,)), ((), ())),
                            preferred_element_type=jnp.float32)
        m = jnp.max(s, axis=-1, keepdims=True)
        p = jnp.exp(s - m)
        p = p * _fast_recip(jnp.sum(p, axis=-1, keepdims=True))
        outs.append(jnp.dot(p.astype(jnp.bfloat16), vh,
                            preferred_element_type=jnp.float32))
    # Single lane-dense (Sq, h*d_k) store.
    o_ref[...] = jnp.concatenate(outs, axis=-1).astype(o_ref.dtype)
    # TODO(synk): tile over Sk with an online softmax (flash) before reusing
    # this kernel for long sequences / masked attention.


def fused_attention(q, k, v, h, d_model, q_off=0, k_off=0, v_off=0):
    """softmax(q k^T / sqrt(d_k)) v per head, head-merged layout.

    q: (B, Sq, *), k/v: (B, Sk, *); the actual Q/K/V features are the
    d_model-wide column block number {q,k,v}_off of the corresponding array.
    Returns (B, Sq, d_model) in torch's transpose(1,2).view(..., h*d_k) layout.
    """
    b, sq = q.shape[0], q.shape[1]
    sk = k.shape[1]
    dk = d_model // h
    scale = 1.0 / (dk ** 0.5)
    return pl.pallas_call(
        functools.partial(_attention_kernel, h=h, scale=scale),
        out_shape=jax.ShapeDtypeStruct((b, sq, d_model), q.dtype),
        grid_spec=pltpu.PrefetchScalarGridSpec(
            num_scalar_prefetch=0,
            grid=(b,),
            in_specs=[
                pl.BlockSpec((None, sq, d_model), lambda i: (i, 0, q_off)),
                pl.BlockSpec((None, sk, d_model), lambda i: (i, 0, k_off)),
                pl.BlockSpec((None, sk, d_model), lambda i: (i, 0, v_off)),
            ],
            out_specs=pl.BlockSpec((None, sq, d_model), lambda i: (i, 0, 0)),
        ),
        compiler_params=pltpu.CompilerParams(
            dimension_semantics=("parallel",),
            vmem_limit_bytes=_VMEM_LIMIT_BYTES,
        ),
    )(q, k, v)


# ---------------------------------------------------------------------------
# Model glue (same structure as the PyTorch module), ops-injected so the same
# code runs through the Pallas kernels or through a pure-JAX reference.
# ---------------------------------------------------------------------------
def multi_head_attention(ops, p, query, key, value, residual=None):
    d_model = query.shape[-1]
    h = p["h"]
    lin = ops["linear"]
    # Fuse projections sharing the same input into one wide GEMM; the attention
    # op then picks Q/K/V out of the fused activation via feature-block offsets.
    if (query is key) and (key is value):
        w = jnp.concatenate([p["wq"], p["wk"], p["wv"]], axis=1)
        bb = jnp.concatenate([p["bq"], p["bk"], p["bv"]])
        qkv = lin(query, w, bb)
        q_arr = k_arr = v_arr = qkv
        q_off, k_off, v_off = 0, 1, 2
    elif query is key:
        w = jnp.concatenate([p["wq"], p["wk"]], axis=1)
        bb = jnp.concatenate([p["bq"], p["bk"]])
        qk = lin(query, w, bb)
        v_arr = lin(value, p["wv"], p["bv"])
        q_arr = k_arr = qk
        q_off, k_off, v_off = 0, 1, 0
    elif key is value:
        q_arr = lin(query, p["wq"], p["bq"])
        w = jnp.concatenate([p["wk"], p["wv"]], axis=1)
        bb = jnp.concatenate([p["bk"], p["bv"]])
        kv = lin(key, w, bb)
        k_arr = v_arr = kv
        q_off, k_off, v_off = 0, 0, 1
    else:
        q_arr = lin(query, p["wq"], p["bq"])
        k_arr = lin(key, p["wk"], p["bk"])
        v_arr = lin(value, p["wv"], p["bv"])
        q_off = k_off = v_off = 0

    o = ops["attention"](q_arr, k_arr, v_arr, h, d_model,
                         q_off=q_off, k_off=k_off, v_off=v_off)
    # Residual add fused into the output-projection epilogue.
    return lin(o, p["wo"], p["bo"], residual=residual)


def feed_forward(ops, p, x, residual=None):
    hid = ops["linear"](x, p["w1"], p["b1"], activation="relu")
    return ops["linear"](hid, p["w2"], p["b2"], residual=residual)


def encoder_layer(ops, p, x):
    y = ops["layer_norm"](x, p["ln0"]["a"], p["ln0"]["b"])
    x = multi_head_attention(ops, p["self_attn"], y, y, y, residual=x)
    y = ops["layer_norm"](x, p["ln1"]["a"], p["ln1"]["b"])
    return feed_forward(ops, p["ff"], y, residual=x)


def encoder(ops, p, x):
    for lp in p["layers"]:
        x = encoder_layer(ops, lp, x)
    return ops["layer_norm"](x, p["norm"]["a"], p["norm"]["b"])


def decoder_layer(ops, p, x, memory):
    y = ops["layer_norm"](x, p["ln0"]["a"], p["ln0"]["b"])
    x = multi_head_attention(ops, p["self_attn"], y, y, y, residual=x)
    y = ops["layer_norm"](x, p["ln1"]["a"], p["ln1"]["b"])
    x = multi_head_attention(ops, p["src_attn"], y, memory, memory, residual=x)
    y = ops["layer_norm"](x, p["ln2"]["a"], p["ln2"]["b"])
    return feed_forward(ops, p["ff"], y, residual=x)


def decoder(ops, p, x, memory):
    for lp in p["layers"]:
        x = decoder_layer(ops, lp, x, memory)
    return ops["layer_norm"](x, p["norm"]["a"], p["norm"]["b"])


def decoder_layer_pos_embed(ops, p, x, memory, pos=None, query_pos=None):
    y = ops["layer_norm"](x, p["ln0"]["a"], p["ln0"]["b"])
    q = y if query_pos is None else y + query_pos
    x = multi_head_attention(ops, p["self_attn"], q, q, y, residual=x)
    y = ops["layer_norm"](x, p["ln1"]["a"], p["ln1"]["b"])
    q = y if query_pos is None else y + query_pos
    m = memory if pos is None else memory + pos
    x = multi_head_attention(ops, p["src_attn"], q, m, memory, residual=x)
    y = ops["layer_norm"](x, p["ln2"]["a"], p["ln2"]["b"])
    return feed_forward(ops, p["ff"], y, residual=x)


def decoder_multi_query(ops, p, x, memory, pos=None, query_pos=None,
                        return_intermediate=False):
    intermediate = []
    for lp in p["layers"]:
        x = decoder_layer_pos_embed(ops, lp, x, memory, pos=pos, query_pos=query_pos)
        if return_intermediate:
            intermediate.append(ops["layer_norm"](x, p["norm"]["a"], p["norm"]["b"]))
    if return_intermediate:
        # torch pops the last entry and re-appends norm(x_final): numerically
        # identical to what is already stored, so just stack.
        return jnp.stack(intermediate)
    return ops["layer_norm"](x, p["norm"]["a"], p["norm"]["b"])


def transformer_multi_query(ops, params, src, tgt, return_intermediate=False):
    # src, tgt: (B, pc_feat_dim, N) exactly like the torch module's inputs.
    src = jnp.transpose(src, (0, 2, 1))
    tgt = jnp.transpose(tgt, (0, 2, 1))
    # EncoderDecoder is called as model(tgt, src, None, None): encode tgt,
    # decode src against that memory (all masks are None).
    memory = encoder(ops, params["encoder"], tgt)
    src_corr_feat = decoder(ops, params["decoder"], src, memory)

    b = src.shape[0]
    query_embed = jnp.broadcast_to(
        params["query_embed"], (b,) + params["query_embed"].shape[1:])
    query_token = jnp.zeros_like(query_embed)
    out = decoder_multi_query(ops, params["dec_mq"], query_token, src_corr_feat,
                              pos=None, query_pos=query_embed,
                              return_intermediate=return_intermediate)
    if out.ndim == 4:                          # (N_blocks, B, nq, d) -> (B, N, nq, d)
        out = jnp.transpose(out, (1, 0, 2, 3))
    return out


# ---------------------------------------------------------------------------
# Pure-JAX reference ops (for correctness checking only).  `mxu_dtype` rounds
# matmul inputs exactly like the kernels do (bf16 into the MXU, f32 accumulate)
# so Pallas vs reference can be checked tightly; with mxu_dtype=f32 it is the
# plain full-precision reference of the torch module.
# ---------------------------------------------------------------------------
def make_ref_ops(mxu_dtype=jnp.float32):
    def cast(x):
        return x.astype(mxu_dtype).astype(jnp.float32)

    def ref_layer_norm(x, a, b, eps=1e-6):
        mean = jnp.mean(x, axis=-1, keepdims=True)
        var = jnp.sum((x - mean) ** 2, axis=-1, keepdims=True) / (x.shape[-1] - 1)
        return a * (x - mean) / (jnp.sqrt(var) + eps) + b

    def ref_linear(x, w, b, activation=None, residual=None):
        y = jnp.matmul(cast(x), cast(w)) + b
        if activation == "relu":
            y = jnp.maximum(y, 0.0)
        if residual is not None:
            y = y + residual
        return y

    def ref_attention(q, k, v, h, d_model, q_off=0, k_off=0, v_off=0):
        dk = d_model // h
        scale = 1.0 / (dk ** 0.5)
        q = cast(q[..., q_off * d_model:(q_off + 1) * d_model] * scale)
        k = cast(k[..., k_off * d_model:(k_off + 1) * d_model])
        v = cast(v[..., v_off * d_model:(v_off + 1) * d_model])
        b_, sq = q.shape[0], q.shape[1]
        sk = k.shape[1]
        qh = q.reshape(b_, sq, h, dk).transpose(0, 2, 1, 3)
        kh = k.reshape(b_, sk, h, dk).transpose(0, 2, 1, 3)
        vh = v.reshape(b_, sk, h, dk).transpose(0, 2, 1, 3)
        s = jnp.einsum("bhqd,bhkd->bhqk", qh, kh)
        p = cast(jax.nn.softmax(s, axis=-1))
        o = jnp.einsum("bhqk,bhkd->bhqd", p, vh)
        return o.transpose(0, 2, 1, 3).reshape(b_, sq, h * dk)

    return {"layer_norm": ref_layer_norm, "linear": ref_linear,
            "attention": ref_attention}


PALLAS_OPS = {"layer_norm": layer_norm, "linear": linear, "attention": fused_attention}


# ---------------------------------------------------------------------------
# Parameter initialization (deterministic; mirrors module structure, not torch RNG)
# ---------------------------------------------------------------------------
def _init_linear(key, din, dout):
    kw, kb = jax.random.split(key)
    bound = 1.0 / (din ** 0.5)
    w = jax.random.uniform(kw, (din, dout), jnp.float32, -bound, bound)
    b = jax.random.uniform(kb, (dout,), jnp.float32, -bound, bound)
    return w, b


def _init_attn(key, h, d_model):
    kq, kk, kv, ko = jax.random.split(key, 4)
    wq, bq = _init_linear(kq, d_model, d_model)
    wk, bk = _init_linear(kk, d_model, d_model)
    wv, bv = _init_linear(kv, d_model, d_model)
    wo, bo = _init_linear(ko, d_model, d_model)
    return {"h": h, "wq": wq, "bq": bq, "wk": wk, "bk": bk,
            "wv": wv, "bv": bv, "wo": wo, "bo": bo}


def _init_ff(key, d_model, d_ff):
    k1, k2 = jax.random.split(key)
    w1, b1 = _init_linear(k1, d_model, d_ff)
    w2, b2 = _init_linear(k2, d_ff, d_model)
    return {"w1": w1, "b1": b1, "w2": w2, "b2": b2}


def _init_ln(features):
    return {"a": jnp.ones((features,), jnp.float32),
            "b": jnp.zeros((features,), jnp.float32)}


def init_params(key, d_model, d_ff, n_heads, n_blocks, n_queries):
    k_enc, k_dec, k_mq, k_q = jax.random.split(key, 4)

    def enc_layer(k):
        ka, kf = jax.random.split(k)
        return {"self_attn": _init_attn(ka, n_heads, d_model),
                "ff": _init_ff(kf, d_model, d_ff),
                "ln0": _init_ln(d_model), "ln1": _init_ln(d_model)}

    def dec_layer(k):
        ka, kb, kf = jax.random.split(k, 3)
        return {"self_attn": _init_attn(ka, n_heads, d_model),
                "src_attn": _init_attn(kb, n_heads, d_model),
                "ff": _init_ff(kf, d_model, d_ff),
                "ln0": _init_ln(d_model), "ln1": _init_ln(d_model),
                "ln2": _init_ln(d_model)}

    return {
        "encoder": {"layers": [enc_layer(k) for k in jax.random.split(k_enc, n_blocks)],
                    "norm": _init_ln(d_model)},
        "decoder": {"layers": [dec_layer(k) for k in jax.random.split(k_dec, n_blocks)],
                    "norm": _init_ln(d_model)},
        "dec_mq": {"layers": [dec_layer(k) for k in jax.random.split(k_mq, n_blocks)],
                   "norm": _init_ln(d_model)},
        "query_embed": jax.random.normal(k_q, (1, n_queries, d_model), jnp.float32)
                       / (d_model ** 0.5),
    }


if __name__ == "__main__":
    key = jax.random.PRNGKey(0)
    # cfg-equivalent small shapes (pc_feat_dim a multiple of 128 so LayerNorm /
    # linear / attention tiles are lane-dense).
    batch = 2
    n_src = 16              # points per src cloud
    n_tgt = 16              # points per tgt cloud
    d_model = 128           # cfg.model.pc_feat_dim
    d_ff = 256              # cfg.model.transformer_feat_dim
    n_heads = 4             # cfg.model.num_heads
    n_blocks = 2            # cfg.model.num_blocks
    n_queries = 8           # cfg.model.n_queries
    return_intermediate = True  # cfg.model.return_intermediate

    k_param, k_src, k_tgt, k_ln = jax.random.split(key, 4)
    params = init_params(k_param, d_model, d_ff, n_heads, n_blocks, n_queries)
    src = jax.random.normal(k_src, (batch, d_model, n_src), jnp.float32)
    tgt = jax.random.normal(k_tgt, (batch, d_model, n_tgt), jnp.float32)

    # Tight standalone check of the LayerNorm kernel (pure f32 path, torch
    # unbiased-std + eps-on-std semantics).
    x_ln = jax.random.normal(k_ln, (batch, n_src, d_model), jnp.float32)
    ln_p = _init_ln(d_model)
    y_kernel = jax.block_until_ready(layer_norm(x_ln, ln_p["a"], ln_p["b"]))
    y_ref = make_ref_ops()["layer_norm"](x_ln, ln_p["a"], ln_p["b"])
    assert jnp.allclose(y_kernel, y_ref, atol=1e-4, rtol=1e-4), "layer_norm mismatch"

    # Full TransformerMultiQuery forward through the Pallas kernels.
    run_pallas = jax.jit(lambda s, t: transformer_multi_query(
        PALLAS_OPS, params, s, t, return_intermediate))
    # Reference that mirrors the kernels' MXU precision (bf16 in, f32 accum):
    # checks the kernels tightly.
    run_ref_bf16 = jax.jit(lambda s, t: transformer_multi_query(
        make_ref_ops(jnp.bfloat16), params, s, t, return_intermediate))
    # Full-f32 reference (the torch module's numerics): loose check, the slack
    # is purely the deliberate bf16-into-MXU cast.
    run_ref_f32 = jax.jit(lambda s, t: transformer_multi_query(
        make_ref_ops(jnp.float32), params, s, t, return_intermediate))

    out = jax.block_until_ready(run_pallas(src, tgt))
    assert out.shape == (batch, n_blocks, n_queries, d_model), out.shape
    assert bool(jnp.all(jnp.isfinite(out))), "non-finite output"

    ref_b = run_ref_bf16(src, tgt)
    rel_b = jnp.linalg.norm(out - ref_b) / (jnp.linalg.norm(ref_b) + 1e-9)
    assert float(rel_b) < 5e-3, f"kernel vs bf16-mirrored ref: rel_err={float(rel_b)}"

    ref_f = run_ref_f32(src, tgt)
    rel_f = jnp.linalg.norm(out - ref_f) / (jnp.linalg.norm(ref_f) + 1e-9)
    assert float(rel_f) < 1e-1, f"kernel vs f32 ref: rel_err={float(rel_f)}"

    print("KERNEL_OK")
</pallas_src>

<mosaic_0001>
module attributes {stable_mosaic.version = 11 : i64} {
  func.func @_layernorm_kernel(%arg0: i32, %arg1: memref<16x128xf32, #tpu.memory_space<vmem>>, %arg2: memref<1x128xf32, #tpu.memory_space<vmem>>, %arg3: memref<1x128xf32, #tpu.memory_space<vmem>>, %arg4: memref<16x128xf32, #tpu.memory_space<vmem>>) attributes {dimension_semantics = [#tpu.dimension_semantics<parallel>], iteration_bounds = array<i64: 2>, scalar_prefetch = 0 : i64, scratch_operands = 0 : i64, tpu.core_type = #tpu.core_type<tc>, window_params = [{transform_indices = @transform_0, window_bounds = array<i64: 16, 128>}, {pipeline_mode = #tpu.pipeline_mode<synchronous>, transform_indices = @transform_1, window_bounds = array<i64: 1, 128>}, {pipeline_mode = #tpu.pipeline_mode<synchronous>, transform_indices = @transform_2, window_bounds = array<i64: 1, 128>}, {transform_indices = @transform_3, window_bounds = array<i64: 16, 128>}]} {
    %c0 = arith.constant 0 : index
    %c0_0 = arith.constant 0 : index
    %0 = vector.load %arg1[%c0, %c0_0] : memref<16x128xf32, #tpu.memory_space<vmem>>, vector<16x128xf32>
    %cst = arith.constant dense<0.000000e+00> : vector<16xf32>
    %1 = vector.multi_reduction <add>, %0, %cst [1] : vector<16x128xf32> to vector<16xf32>
    %2 = vector.shape_cast %1 : vector<16xf32> to vector<16x1xf32>
    %cst_1 = arith.constant 7.812500e-03 : f32
    %3 = vector.broadcast %cst_1 : f32 to vector<16x1xf32>
    %4 = arith.mulf %2, %3 : vector<16x1xf32>
    %5 = vector.broadcast %4 : vector<16x1xf32> to vector<16x128xf32>
    %6 = arith.subf %0, %5 : vector<16x128xf32>
    %7 = arith.mulf %6, %6 : vector<16x128xf32>
    %cst_2 = arith.constant dense<0.000000e+00> : vector<16xf32>
    %8 = vector.multi_reduction <add>, %7, %cst_2 [1] : vector<16x128xf32> to vector<16xf32>
    %9 = vector.shape_cast %8 : vector<16xf32> to vector<16x1xf32>
    %cst_3 = arith.constant 0.00787401571 : f32
    %10 = vector.broadcast %cst_3 : f32 to vector<16x1xf32>
    %11 = arith.mulf %9, %10 : vector<16x1xf32>
    %12 = math.sqrt %11 : vector<16x1xf32>
    %cst_4 = arith.constant 9.99999997E-7 : f32
    %13 = vector.broadcast %cst_4 : f32 to vector<16x1xf32>
    %14 = arith.addf %12, %13 : vector<16x1xf32>
    %15 = tpu.reciprocal %14 {approx = true} : vector<16x1xf32> -> vector<16x1xf32>
    %16 = arith.mulf %14, %15 : vector<16x1xf32>
    %cst_5 = arith.constant 2.000000e+00 : f32
    %17 = vector.broadcast %cst_5 : f32 to vector<16x1xf32>
    %18 = arith.subf %17, %16 : vector<16x1xf32>
    %19 = arith.mulf %15, %18 : vector<16x1xf32>
    %c0_6 = arith.constant 0 : index
    %c0_7 = arith.constant 0 : index
    %20 = vector.load %arg2[%c0_6, %c0_7] : memref<1x128xf32, #tpu.memory_space<vmem>>, vector<1x128xf32>
    %c0_8 = arith.constant 0 : index
    %c0_9 = arith.constant 0 : index
    %21 = vector.load %arg3[%c0_8, %c0_9] : memref<1x128xf32, #tpu.memory_space<vmem>>, vector<1x128xf32>
    %22 = vector.broadcast %20 : vector<1x128xf32> to vector<16x128xf32>
    %23 = arith.mulf %22, %6 : vector<16x128xf32>
    %24 = vector.broadcast %19 : vector<16x1xf32> to vector<16x128xf32>
    %25 = arith.mulf %23, %24 : vector<16x128xf32>
    %26 = vector.broadcast %21 : vector<1x128xf32> to vector<16x128xf32>
    %27 = arith.addf %25, %26 : vector<16x128xf32>
    %c0_10 = arith.constant 0 : index
    %c0_11 = arith.constant 0 : index
    %28 = vector.load %arg4[%c0_10, %c0_11] : memref<16x128xf32, #tpu.memory_space<vmem>>, vector<16x128xf32>
    tpu.vector_store %arg4[%c0_10, %c0_11], %27 {strides = array<i32>} : memref<16x128xf32, #tpu.memory_space<vmem>>, vector<16x128xf32>,
    return
  }
  func.func @transform_0(%arg0: i32) -> (i32, i32) {
    %c0_i32 = arith.constant 0 : i32
    %c0_i32_0 = arith.constant 0 : i32
    return %arg0, %c0_i32 : i32, i32
  }
  func.func @transform_1(%arg0: i32) -> (i32, i32) {
    %c0_i32 = arith.constant 0 : i32
    %c0_i32_0 = arith.constant 0 : i32
    %c0_i32_1 = arith.constant 0 : i32
    return %c0_i32, %c0_i32_0 : i32, i32
  }
  func.func @transform_2(%arg0: i32) -> (i32, i32) {
    %c0_i32 = arith.constant 0 : i32
    %c0_i32_0 = arith.constant 0 : i32
    %c0_i32_1 = arith.constant 0 : i32
    return %c0_i32, %c0_i32_0 : i32, i32
  }
  func.func @transform_3(%arg0: i32) -> (i32, i32) {
    %c0_i32 = arith.constant 0 : i32
    %c0_i32_0 = arith.constant 0 : i32
    return %arg0, %c0_i32 : i32, i32
  }
}

</mosaic_0001>

<bundles_post_ra>
// kernel: tpu_custom_call.1
= control target key start
LH: loop header
LB: loop body
LE: loop exit
PB: predicated region body
PF: predicated region fallthrough
CT: control target
= control target key end

     0   :  { %8 = vsyncpa [#allocation3], 0  ;;  %s770_s0 = inlined_call_operand.hbm [shape: f32[32,128], index: 0, kind: input, shape index: {}]   ;;  %s771_s1 = inlined_call_operand.hbm [shape: f32[1,128], index: 1, kind: input, shape index: {}]   ;;  %s772_s2 = inlined_call_operand.vmem [shape: f32[1,128], index: 2, kind: input, shape index: {}]   ;;  %s773_s3 = inlined_call_operand.hbm [shape: f32[32,128], index: 3, kind: output, shape index: {}]  }
   0x1   :  { %10 = vsyncpa [#allocation3 + $0x1], 0 }
   0x2   :  { %11 = vsyncpa [#allocation6], 0 }
   0x3   :  { %12 = vsyncpa [#allocation4], 0 }
   0x4   :  { %14 = vsyncpa [#allocation4 + $0x1], 0  ;;  %s621_s12 = smov 0   ;;  %s623_s13 = smov 0  }
   0x5   :  { %s625_s14 = smov 0   ;;  %s627_s15 = smov 0  }
   0x6 LB: > { %s642_s16 = sadd.s32 4294967295, %s594_s15   ;;  %s375_s17 = sadd.s32 4294967294, %s594_s15   ;;  %s594_s15 = sphi %s627_s15, %s784_s15   ;;  %s590_s14 = sphi %s625_s14, %s783_s14   ;;  %s586_s13 = sphi %s623_s13, %s782_s13   ;;  %s582_s12 = sphi %s621_s12, %s781_s12  }
   0x7   : > { %s646_s18 = sadd.s32 1, %s594_s15   ;;  %s27_s19 = sadd.s32 1, %s590_s14 }
   0x8   : > { %s24_s20 = ssub.s32 %s594_s15, %s646_s18  ;;  %p34_p0 = scmp.ne.s32.totalorder %s590_s14, %s586_s13 }
   0x9   : > { %p25_p1 = scmp.eq.s32.totalorder %s24_s20, 0  ;;  %p35_p2 = scmp.eq.s32.totalorder %s594_s15, 0 }
   0xa   : > { %p40_p3 = scmp.ne.s32.totalorder %s586_s13, %s582_s12  ;;  %p41_p4 = scmp.eq.s32.totalorder %s642_s16, 0 }
   0xb   : > { %s658_s21 = scalar_select %p25_p1, %s590_s14, %s27_s19  }
   0xc   : > { %p660_p5 = por %p35_p2, %p34_p0  ;;  %p666_p6 = por %p41_p4, %p40_p3 }
   0xd   : > { %p106_p7 = scmp.eq.s32.totalorder %s642_s16, 1  ;;  %p112_p8 = scmp.eq.s32.totalorder %s375_s17, 1 }
   0xe   : > { %p376_p9 = scmp.ge.s32.totalorder %s594_s15, 1  ;;  %p119_p10 = scmp.lt.s32.totalorder %s594_s15, 3 }
   0xf   : > { %p673_p11 = por %p106_p7, %p34_p0  ;;  %p677_p12 = por %p112_p8, %p40_p3 }
  0x10   : > { %p681_p13 = pnand %p376_p9, %p119_p10  ;;  %s131_s29 = sshll.u32 %s771_s1, 4  ;;  %s132_s29 = int_to_ptr.hbm [resolvable:$true] %s131_s29 }
  0x11   : > { %s596_s30 = smov [#allocation5]   ;;  %p414_p3 = scmp.lt.s32.totalorder %s594_s15, 2 }
  0x12   : > { %p401_p1 = pneg %p681_p13  ;;  %s133_s4 = sshll.u32 %s596_s30, 4  ;;  %s134_s4 = int_to_ptr.vmem [resolvable:$true] %s133_s4 }
  0x13   : > { %s147_s5 = sand.u32 1, %s590_s14   ;;  %p697_p7 = pnand %p414_p3, %p660_p5 }
  0x14   : > { %p402_p2 = pnand %p401_p1, %p41_p4  ;;  %s379_s7 = sshll.u32 %s147_s5, 4 }
  0x15   : > { %s391_s8 = sshll.u32 %s594_s15, 4  ;;  %s151_s19 = scalar_lea.vmem [#allocation2], %s379_s7 }
  0x16   : > { %404 = dma.hbm_to_vmem [thread:$0]  (!%p402_p2), %s132_s29, 16, %s134_s4, [#allocation6]  }
  0x17   : > { %s156_s11 = scalar_lea.hbm %s770_s0, %s391_s8  ;;  %s159_s20 = sshll.u32 %s151_s19, 4  ;;  %s160_s20 = int_to_ptr.vmem [resolvable:$true] %s159_s20 }
  0x18   : > { %s157_s17 = sshll.u32 %s156_s11, 4  ;;  %s148_s27 = scalar_lea.sflag [#allocation3], %s147_s5  ;;  %s158_s17 = int_to_ptr.hbm [resolvable:$true] %s157_s17 }
  0x19   : > { %s494_s28 = sshra.s32 %s158_s17, 4  ;;  %p498_p8 = pneg %p697_p7  ;;  %s495_s28 = int_to_ptr.hbm [resolvable:$true] %s494_s28 }
  0x1a   : > { %s496_s22 = scalar_lea.hbm %s495_s28, 16  ;;  %s501_s4 = scalar_lea.hbm %s770_s0, 32 }
  0x1b   : > { %p497_p5 = scmp.ne.s32.totalorder %s495_s28, %s496_s22  ;;  %p502_p1 = scmp.lt.s32.totalorder %s495_s28, %s770_s0 }
  0x1c   : > { %p503_p2 = scmp.lt.s32.totalorder %s501_s4, %s496_s22 }
  0x1d   : > { %p499_p9 = pnand %p498_p8, %p497_p5 }
  0x1e   : > { %p504_p3 = por %p503_p2, %p502_p1 }
  0x1f   : > { %p500_p10 = pneg %p499_p9 }
  0x21   : > { %p505_p0 = pnand %p504_p3, %p500_p10 }
  0x23   : > { %508 = shalt.err (!%p505_p0)
}
  0x24   : > { %s597_s5 = smov 128   ;;  %s598_s7 = smov 8  }
  0x25   : > { %408 = dma.hbm_to_vmem [thread:$0]  (!%p697_p7), %s158_s17, 256, %s160_s20, %s148_s27, %s597_s5, %s597_s5, %s598_s7  }
  0x26   : > { %171 = sbr.rel (%p681_p13) target bundleno = 339 (0x153), region = 32  ;;  %s718_s10 = sand.u32 (!%p681_p13), 1, %s586_s13  }
  0x27   : > { %s383_s11 = sshll.u32 (!%p681_p13), %s718_s10, 4  ;;  %s174_s19 = scalar_lea.sflag (!%p681_p13), [#allocation3], %s718_s10 }
  0x28   : > { %s177_s28 = scalar_lea.vmem (!%p681_p13), [#allocation2], %s383_s11 }
  0x2b   : > { %569 = dma.done.wait (%p666_p6), %s174_s19, 256  }
  0x2c   : > { %571 = vsyncadd (%p666_p6), %s174_s19, 4294967040 }
  0x2d   : > { %573 = dma.done.wait (%p41_p4), [#allocation6], 16  }
  0x2e   : > { %575 = vsyncadd (%p41_p4), [#allocation6], 4294967280  ;;  %v208_v0 = vld [vmem:[%s177_s28] sm:$0xff]  ;;  %v209_v1 = vld [vmem:[%s177_s28 + $0x8] sm:$0xff]  ;;  %s392_s6 = sshll.u32 %s642_s16, 4  ;;  %s205_s22 = scalar_lea.vmem [#allocation7], %s383_s11 }
  0x2f   : > { %210 = vadd.xlane.f32.xlu0 %v208_v0  ;;  %v454_v37 = vld [vmem:[#allocation5] ss:$0 sm:$0xff]  ;;  %s288_s27 = scalar_lea.hbm %s773_s3, %s392_s6  ;;  %s289_s29 = sshll.u32 %s205_s22, 4  ;;  %s290_s29 = int_to_ptr.vmem [resolvable:$true] %s289_s29 }
  0x30   : > { %v455_v42 = vld [vmem:[%s772_s2] ss:$0 sm:$0xff]  ;;  %s291_s30 = sshll.u32 %s288_s27, 4  ;;  %s277_s16 = scalar_lea.sflag [#allocation4], %s718_s10  ;;  %s292_s30 = int_to_ptr.hbm [resolvable:$true] %s291_s30 }
  0x31   : > { %s538_s4 = sshra.s32 %s292_s30, 4  ;;  %s544_s7 = scalar_lea.hbm %s773_s3, 32  ;;  %s539_s4 = int_to_ptr.hbm [resolvable:$true] %s538_s4 }
  0x32   : > { %s540_s9 = scalar_lea.hbm %s539_s4, 16  ;;  %p545_p0 = scmp.lt.s32.totalorder %s539_s4, %s773_s3 }
  0x33   : > { %p541_p4 = scmp.ne.s32.totalorder %s539_s4, %s540_s9  ;;  %p546_p7 = scmp.lt.s32.totalorder %s544_s7, %s540_s9 }
  0x35   : > { %p542_p6 = pnand %p541_p4, %p673_p11  ;;  %p547_p5 = por %p546_p7, %p545_p0 }
  0x37   : > { %212 = vadd.xlane.f32.xlu0 %v209_v1  ;;  %p543_p13 = pneg %p542_p6 }
  0x39   : > { %p548_p8 = pnand %p547_p5, %p543_p13 }
  0xa2   : > { %v211_v2 = vpop.xlane.xlu0 %210 }
  0xa3   : > { %v214_v3 = vmul.f32 0.0078125, %v211_v2 }
  0xa5   : > { %v216_v4 = vsub.f32 %v208_v0, %v214_v3 }
  0xa7   : > { %v218_v5 = vmul.f32 %v216_v4, %v216_v4  ;;  %v265_v40 = vmul.f32 %v454_v37, %v216_v4 }
  0xa9   : > { %220 = vadd.xlane.f32.xlu1 %v218_v5 }
  0xaa   : > { %v213_v6 = vpop.xlane.xlu0 %212 }
  0xab   : > { %v215_v7 = vmul.f32 0.0078125, %v213_v6 }
  0xad   : > { %v217_v8 = vsub.f32 %v209_v1, %v215_v7 }
  0xaf   : > { %v219_v9 = vmul.f32 %v217_v8, %v217_v8  ;;  %v266_v48 = vmul.f32 %v454_v37, %v217_v8 }
  0xb1   : > { %222 = vadd.xlane.f32.xlu1 %v219_v9 }
 0x11c   : > { %v221_v10 = vpop.xlane.xlu1 %220 }
 0x11d   : > { %v224_v11 = vmul.f32 0.007874016, %v221_v10 }
 0x11f   : > { %456 = vrsqrt.f32 %v224_v11  ;;  %vm233_vm0 = vcmp.eq.f32.partialorder %v224_v11, inf  ;;  %v236_v24 = vand.u32 2147483648, %v224_v11  ;;  %vm235_vm1 = vcmp.eq.f32.partialorder %v224_v11, 0.0 }
 0x124   : > { %v223_v12 = vpop.xlane.xlu1 %222 }
 0x125   : > { %v457_v13 = vpop.eup %456  ;;  %v225_v14 = vmul.f32 0.007874016, %v223_v12 }
 0x126   : > { %v227_v15 = vmul.f32 %v457_v13, %v224_v11 }
 0x127   : > { %458 = vrsqrt.f32 %v225_v14  ;;  %vm245_vm2 = vcmp.eq.f32.partialorder %v225_v14, inf  ;;  %v248_v32 = vand.u32 2147483648, %v225_v14  ;;  %vm247_vm3 = vcmp.eq.f32.partialorder %v225_v14, 0.0 }
 0x128   : > { %v228_v16 = vmul.f32 %v457_v13, %v227_v15 }
 0x12a   : > { %v229_v17 = vmul.f32 0.5, %v228_v16 }
 0x12c   : > { %v230_v18 = vsub.f32 1.5, %v229_v17 }
 0x12d   : > { %v459_v19 = vpop.eup %458 }
 0x12e   : > { %v231_v20 = vmul.f32 %v457_v13, %v230_v18  ;;  %v239_v21 = vmul.f32 %v459_v19, %v225_v14 }
 0x130   : > { %v232_v22 = vmul.f32 %v231_v20, %v224_v11  ;;  %v240_v23 = vmul.f32 %v459_v19, %v239_v21 }
 0x132   : > { %v234_v25 = vsel %vm233_vm0, %v224_v11, %v232_v22  ;;  %v241_v26 = vmul.f32 0.5, %v240_v23 }
 0x133   : > { %v237_v27 = vsel %vm235_vm1, %v236_v24, %v234_v25 }
 0x134   : > { %v250_v28 = vadd.f32 1e-06, %v237_v27  ;;  %v242_v29 = vsub.f32 1.5, %v241_v26 }
 0x136   : > { %460 = vrcp.f32 %v250_v28  ;;  %v243_v30 = vmul.f32 %v459_v19, %v242_v29 }
 0x138   : > { %v244_v31 = vmul.f32 %v243_v30, %v225_v14 }
 0x13a   : > { %v246_v33 = vsel %vm245_vm2, %v225_v14, %v244_v31 }
 0x13b   : > { %v249_v34 = vsel %vm247_vm3, %v248_v32, %v246_v33 }
 0x13c   : > { %v461_v35 = vpop.eup %460  ;;  %v251_v36 = vadd.f32 1e-06, %v249_v34 }
 0x13d   : > { %v254_v38 = vmul.f32 %v461_v35, %v250_v28 }
 0x13e   : > { %462 = vrcp.f32 %v251_v36 }
 0x13f   : > { %v256_v39 = vsub.f32 2.0, %v254_v38 }
 0x141   : > { %v258_v41 = vmul.f32 %v461_v35, %v256_v39 }
 0x143   : > { %v267_v43 = vmul.f32 %v265_v40, %v258_v41 }
 0x144   : > { %v463_v44 = vpop.eup %462 }
 0x145   : > { %v255_v45 = vmul.f32 %v463_v44, %v251_v36  ;;  %v272_v46 = vadd.f32 %v455_v42, %v267_v43 }
 0x147   : > { %v257_v47 = vsub.f32 2.0, %v255_v45  ;;  %274 = vst [vmem:[%s205_s22] sm:$0xff] %v272_v46 }
 0x149   : > { %v259_v49 = vmul.f32 %v463_v44, %v257_v47 }
 0x14b   : > { %v268_v50 = vmul.f32 %v266_v48, %v259_v49 }
 0x14d   : > { %v273_v51 = vadd.f32 %v455_v42, %v268_v50 }
 0x14f   : > { %275 = vst [vmem:[%s205_s22 + $0x8] sm:$0xff] %v273_v51 }
 0x150   : > { %551 = shalt.err (!%p548_p8)
}
 0x151   : > { %s599_s10 = smov 128   ;;  %s600_s28 = smov 8  }
 0x152   : > { %399 = dma.vmem_to_hbm [thread:$0]  (%p673_p11), %s290_s29, 256, %s292_s30, %s277_s16, %s599_s10, %s599_s10, %s600_s28  }
 0x153 PF: > { %s306_s23 = sand.u32 1, %s582_s12   ;;  %p780_p9 = scmp.ge.s32.totalorder %s594_s15, 2 }
 0x154   : > { %s307_s26 = scalar_lea.sflag [#allocation4], %s306_s23 }
 0x155   : > { %p410_p10 = pnand %p780_p9, %p677_p12 }
 0x157   : > { %p411_p1 = pneg %p410_p10 }
 0x159   : > { %577 = dma.done.wait (%p411_p1), %s307_s26, 256  }
 0x15a   : > { %579 = vsyncadd (%p411_p1), %s307_s26, 4294967040  ;;  %p17_p2 = scmp.ge.s32.totalorder %s646_s18, 4   ;;  %s781_s12 = smov %s586_s13 }
 0x15b   : > { %s782_s13 = smov %s590_s14  ;;  %s783_s14 = smov %s658_s21 }
 0x15c   : > { %s784_s15 = smov %s646_s18  ;;  %19 = sbr.rel (!%p17_p2) target bundleno = 6 (0x6), region = 81 }
 0x161   :  { %313 = vsyncpa [#allocation3], 1 }
 0x162   :  { %315 = vsyncpa [#allocation3 + $0x1], 1 }
 0x163   :  { %316 = vsyncpa [#allocation6], 1 }
 0x164   :  { %317 = vsyncpa [#allocation4], 1 }
 0x165   :  { %319 = vsyncpa [#allocation4 + $0x1], 1 }

</bundles_post_ra>
